<compile_context>
chip_gen: v6e
topology: v6e:2x2x1
jax: 0.10.0
libtpu: 0.0.40
codegen_flags: <defaults>
</compile_context>

<pallas_src>
import jax
import jax.numpy as jnp
from jax.experimental import pallas as pl
from jax.experimental.pallas import tpu as pltpu

V_THRESHOLD = 1.0  # spikingjelly IFNode default


def _round_up(x, m):
    return (x + m - 1) // m * m


def snn_layer_kernel(x_ref, w1t_ref, w2t_ref, out_ref, acc_ref):
    k = pl.program_id(1)

    @pl.when(k == 0)
    def _init():
        acc_ref[...] = jnp.zeros_like(acc_ref)

    # In-kernel bf16 cast of the f32 input tile (removes the wrapper pad/cast HBM pass).
    x_bf = x_ref[...].astype(w1t_ref.dtype)

    # Layer 1: full-Din contraction against one Dhid block of W1^T.
    # Threshold in f32 (cheap on v5e), spikes cast to bf16 (exact 0/1) for the MXU.
    h = jnp.dot(x_bf, w1t_ref[...], preferred_element_type=jnp.float32)
    s1 = (h >= V_THRESHOLD).astype(w2t_ref.dtype)

    # Layer 2: partial product for this Dhid block, accumulated in f32.
    acc_ref[...] += jnp.dot(s1, w2t_ref[...], preferred_element_type=jnp.float32)

    @pl.when(k == pl.num_programs(1) - 1)
    def _finalize():
        out_ref[...] = (acc_ref[...] >= V_THRESHOLD).astype(out_ref.dtype)


def prepare_snn_weights(w1, w2, dtype=jnp.bfloat16):
    """One-time prep: PyTorch Linear layout (Dhid,Din)/(Dout,Dhid) -> row-major-dot layout
    (Din,Dhid)/(Dhid,Dout), cast to bf16, zero-pad dims to multiples of 128 (only if needed).
    Call ONCE outside the inference loop."""
    dhid, din = w1.shape
    dout = w2.shape[0]
    din_p, dhid_p, dout_p = _round_up(din, 128), _round_up(dhid, 128), _round_up(dout, 128)

    w1t = w1.T.astype(dtype)
    w2t = w2.T.astype(dtype)
    if (din_p, dhid_p) != (din, dhid):
        w1t = jnp.zeros((din_p, dhid_p), dtype).at[:din, :dhid].set(w1t)
    if (dhid_p, dout_p) != (dhid, dout):
        w2t = jnp.zeros((dhid_p, dout_p), dtype).at[:dhid, :dout].set(w2t)
    return w1t, w2t, (din, dhid, dout)


def snn_layer_forward(x, w1t, w2t, dims, *, tb=64, tk=None):
    """x: (B, Din) float32; w1t: (Din_p, Dhid_p); w2t: (Dhid_p, Dout_p) from prepare_snn_weights.
    Returns bf16 spikes (exactly 0/1)."""
    din, _, dout = dims
    b = x.shape[0]
    din_p, dhid_p = w1t.shape
    dout_p = w2t.shape[1]
    wdtype = w1t.dtype

    if tk is None:
        tk = min(dhid_p, 512)
    assert tk % 128 == 0 and dhid_p % tk == 0, "tk must be a 128-multiple dividing Dhid_p"
    assert tb % 8 == 0, "tb must be a multiple of 8"

    # Pad x only when a real pad is needed (keeps f32; bf16 cast happens inside the kernel).
    b_p = _round_up(b, tb)
    if b_p != b or din_p != din:
        xp = jnp.zeros((b_p, din_p), x.dtype).at[:b, :din].set(x)
    else:
        xp = x

    grid = (b_p // tb, dhid_p // tk)

    itemw = jnp.dtype(wdtype).itemsize
    itemx = jnp.dtype(xp.dtype).itemsize
    vmem_est = (
        2 * tb * din_p * itemx            # x tile (double buffered, f32)
        + 2 * din_p * tk * itemw          # W1^T block (double buffered, streamed over k)
        + 2 * tk * dout_p * itemw         # W2^T block (double buffered, streamed over k)
        + 2 * tb * dout_p * itemw         # out tile (double buffered, bf16)
        + tb * dout_p * 4                 # f32 accumulator scratch
        + tb * tk * 4 + tb * tk * itemw   # h / s1 intermediates
    )
    # Only raise above the 32 MiB scoped-VMEM default when needed; cap at 48 MiB so the
    # request stays well below v7x's 64 MiB physical VMEM (compiler scratch headroom).
    vmem_limit = int(min(max(int(1.5 * vmem_est), 32 << 20), 48 << 20))

    out = pl.pallas_call(
        snn_layer_kernel,
        out_shape=jax.ShapeDtypeStruct((b_p, dout_p), wdtype),
        grid_spec=pltpu.PrefetchScalarGridSpec(
            num_scalar_prefetch=0,
            grid=grid,
            in_specs=[
                # batch tile of x (f32, cast in-kernel); grid-invariant over k -> no re-DMA
                pl.BlockSpec((tb, din_p), lambda i, k: (i, 0)),
                # Dhid-blocked weight slabs, streamed/double-buffered along the k axis
                pl.BlockSpec((din_p, tk), lambda i, k: (0, k)),
                pl.BlockSpec((tk, dout_p), lambda i, k: (k, 0)),
            ],
            out_specs=pl.BlockSpec((tb, dout_p), lambda i, k: (i, 0)),
            scratch_shapes=[pltpu.VMEM((tb, dout_p), jnp.float32)],
        ),
        compiler_params=pltpu.CompilerParams(
            dimension_semantics=("parallel", "arbitrary"),
            vmem_limit_bytes=vmem_limit,
        ),
    )(xp, w1t, w2t)

    # Only un-pad when a real slice is required (avoids an extra HBM copy otherwise).
    if b_p != b or dout_p != dout:
        out = out[:b, :dout]
    return out


def reference_forward(x, w1, w2, dtype=jnp.bfloat16):
    """Same numerics as the kernel (bf16 operands, f32 accumulation)."""
    xq = x.astype(dtype)
    h = jnp.dot(xq, w1.astype(dtype).T, preferred_element_type=jnp.float32)
    s1 = (h >= V_THRESHOLD).astype(dtype)
    o = jnp.dot(s1, w2.astype(dtype).T, preferred_element_type=jnp.float32)
    return (o >= V_THRESHOLD).astype(jnp.float32)


if __name__ == "__main__":
    # dims = [input, features, output] as in SNNLayer(dims=[...]).
    # B=256 with tb=64 -> 4 parallel grid steps (>= 2 per v7x TensorCore);
    # Dhid=256 with tk=128 -> 2 reduction steps (exercises the accumulator path).
    B, Din, Dhid, Dout = 256, 128, 256, 128

    key = jax.random.PRNGKey(0)
    kx, kw1, kw2 = jax.random.split(key, 3)

    # Deterministic "parameters": PyTorch nn.Linear default init
    # U(-1/sqrt(fan_in), 1/sqrt(fan_in)), scaled up so some neurons spike.
    b1 = 1.0 / jnp.sqrt(jnp.float32(Din))
    b2 = 1.0 / jnp.sqrt(jnp.float32(Dhid))
    w1 = jax.random.uniform(kw1, (Dhid, Din), jnp.float32, -b1, b1) * 4.0
    w2 = jax.random.uniform(kw2, (Dout, Dhid), jnp.float32, -b2, b2) * 4.0

    # Input: non-negative "pixel intensities" in [0, 1].
    x = jax.random.uniform(kx, (B, Din), jnp.float32, 0.0, 1.0)

    # One-time weight prep (transpose + bf16 cast + pad), kept out of the per-call path.
    w1t, w2t, dims = prepare_snn_weights(w1, w2)

    out = snn_layer_forward(x, w1t, w2t, dims, tb=64, tk=128)
    out = jax.block_until_ready(out)

    ref = reference_forward(x, w1, w2)
    assert out.shape == (B, Dout)
    assert out.dtype == jnp.bfloat16

    # Spikes can flip on exact-threshold ties if accumulation order differs; allow a tiny fraction.
    mismatches = int(jnp.sum(out.astype(jnp.float32) != ref))
    assert mismatches <= max(4, out.size // 1000), (
        f"Pallas output mismatch vs reference: {mismatches}/{out.size} spikes differ"
    )

    print("KERNEL_OK")
</pallas_src>

<mosaic_0001>
module attributes {stable_mosaic.version = 11 : i64} {
  func.func @snn_layer_kernel(%arg0: i32, %arg1: i32, %arg2: memref<64x128xf32, #tpu.memory_space<vmem>>, %arg3: memref<128x128xbf16, #tpu.memory_space<vmem>>, %arg4: memref<128x128xbf16, #tpu.memory_space<vmem>>, %arg5: memref<64x128xbf16, #tpu.memory_space<vmem>>, %arg6: memref<64x128xf32, #tpu.memory_space<vmem>>) attributes {dimension_semantics = [#tpu.dimension_semantics<parallel>, #tpu.dimension_semantics<arbitrary>], iteration_bounds = array<i64: 4, 2>, scalar_prefetch = 0 : i64, scratch_operands = 1 : i64, tpu.core_type = #tpu.core_type<tc>, window_params = [{transform_indices = @transform_0, window_bounds = array<i64: 64, 128>}, {transform_indices = @transform_1, window_bounds = array<i64: 128, 128>}, {transform_indices = @transform_2, window_bounds = array<i64: 128, 128>}, {transform_indices = @transform_3, window_bounds = array<i64: 64, 128>}]} {
    %c0_i32 = arith.constant 0 : i32
    %0 = arith.cmpi eq, %arg1, %c0_i32 : i32
    %1 = arith.extui %0 : i1 to i32
    %c0_i32_0 = arith.constant 0 : i32
    %2 = arith.cmpi ne, %1, %c0_i32_0 : i32
    scf.if %2 {
      %cst_13 = arith.constant 0.000000e+00 : f32
      %20 = vector.broadcast %cst_13 : f32 to vector<64x128xf32>
      %c0_14 = arith.constant 0 : index
      %c0_15 = arith.constant 0 : index
      %21 = vector.load %arg6[%c0_14, %c0_15] : memref<64x128xf32, #tpu.memory_space<vmem>>, vector<64x128xf32>
      tpu.vector_store %arg6[%c0_14, %c0_15], %20 {strides = array<i32>} : memref<64x128xf32, #tpu.memory_space<vmem>>, vector<64x128xf32>,
    } else {
    }
    %c0 = arith.constant 0 : index
    %c0_1 = arith.constant 0 : index
    %3 = vector.load %arg2[%c0, %c0_1] : memref<64x128xf32, #tpu.memory_space<vmem>>, vector<64x128xf32>
    %4 = arith.truncf %3 : vector<64x128xf32> to vector<64x128xbf16>
    %c0_2 = arith.constant 0 : index
    %c0_3 = arith.constant 0 : index
    %5 = vector.load %arg3[%c0_2, %c0_3] : memref<128x128xbf16, #tpu.memory_space<vmem>>, vector<128x128xbf16>
    %cst = arith.constant dense<0.000000e+00> : vector<64x128xf32>
    %6 = tpu.matmul %4, %5, %cst {dimension_numbers = #tpu.dot_dimension_numbers<[1], [0], [0], [1], [0, 0, 1, 1], [], []>} : vector<64x128xbf16>, vector<128x128xbf16>, vector<64x128xf32> -> vector<64x128xf32>
    %cst_4 = arith.constant 1.000000e+00 : f32
    %7 = vector.broadcast %cst_4 : f32 to vector<64x128xf32>
    %8 = arith.cmpf oge, %6, %7 : vector<64x128xf32>
    %9 = arith.extui %8 : vector<64x128xi1> to vector<64x128xi32>
    %10 = arith.sitofp %9 : vector<64x128xi32> to vector<64x128xf32>
    %11 = arith.truncf %10 : vector<64x128xf32> to vector<64x128xbf16>
    %c0_5 = arith.constant 0 : index
    %c0_6 = arith.constant 0 : index
    %12 = vector.load %arg6[%c0_5, %c0_6] : memref<64x128xf32, #tpu.memory_space<vmem>>, vector<64x128xf32>
    %c0_7 = arith.constant 0 : index
    %c0_8 = arith.constant 0 : index
    %13 = vector.load %arg4[%c0_7, %c0_8] : memref<128x128xbf16, #tpu.memory_space<vmem>>, vector<128x128xbf16>
    %cst_9 = arith.constant dense<0.000000e+00> : vector<64x128xf32>
    %14 = tpu.matmul %11, %13, %cst_9 {dimension_numbers = #tpu.dot_dimension_numbers<[1], [0], [0], [1], [0, 0, 1, 1], [], []>} : vector<64x128xbf16>, vector<128x128xbf16>, vector<64x128xf32> -> vector<64x128xf32>
    %15 = arith.addf %12, %14 : vector<64x128xf32>
    %c0_10 = arith.constant 0 : index
    %c0_11 = arith.constant 0 : index
    %16 = vector.load %arg6[%c0_10, %c0_11] : memref<64x128xf32, #tpu.memory_space<vmem>>, vector<64x128xf32>
    tpu.vector_store %arg6[%c0_10, %c0_11], %15 {strides = array<i32>} : memref<64x128xf32, #tpu.memory_space<vmem>>, vector<64x128xf32>,
    %c1_i32 = arith.constant 1 : i32
    %17 = arith.cmpi eq, %arg1, %c1_i32 : i32
    %18 = arith.extui %17 : i1 to i32
    %c0_i32_12 = arith.constant 0 : i32
    %19 = arith.cmpi ne, %18, %c0_i32_12 : i32
    scf.if %19 {
      %c0_13 = arith.constant 0 : index
      %c0_14 = arith.constant 0 : index
      %20 = vector.load %arg6[%c0_13, %c0_14] : memref<64x128xf32, #tpu.memory_space<vmem>>, vector<64x128xf32>
      %cst_15 = arith.constant 1.000000e+00 : f32
      %21 = vector.broadcast %cst_15 : f32 to vector<64x128xf32>
      %22 = arith.cmpf oge, %20, %21 : vector<64x128xf32>
      %23 = arith.extui %22 : vector<64x128xi1> to vector<64x128xi32>
      %24 = arith.sitofp %23 : vector<64x128xi32> to vector<64x128xf32>
      %25 = arith.truncf %24 : vector<64x128xf32> to vector<64x128xbf16>
      %c0_16 = arith.constant 0 : index
      %c0_17 = arith.constant 0 : index
      %26 = vector.load %arg5[%c0_16, %c0_17] : memref<64x128xbf16, #tpu.memory_space<vmem>>, vector<64x128xbf16>
      tpu.vector_store %arg5[%c0_16, %c0_17], %25 {strides = array<i32>} : memref<64x128xbf16, #tpu.memory_space<vmem>>, vector<64x128xbf16>,
    } else {
    }
    return
  }
  func.func @transform_0(%arg0: i32, %arg1: i32) -> (i32, i32) {
    %c0_i32 = arith.constant 0 : i32
    %c0_i32_0 = arith.constant 0 : i32
    return %arg0, %c0_i32 : i32, i32
  }
  func.func @transform_1(%arg0: i32, %arg1: i32) -> (i32, i32) {
    %c0_i32 = arith.constant 0 : i32
    %c0_i32_0 = arith.constant 0 : i32
    return %c0_i32, %arg1 : i32, i32
  }
  func.func @transform_2(%arg0: i32, %arg1: i32) -> (i32, i32) {
    %c0_i32 = arith.constant 0 : i32
    %c0_i32_0 = arith.constant 0 : i32
    return %arg1, %c0_i32 : i32, i32
  }
  func.func @transform_3(%arg0: i32, %arg1: i32) -> (i32, i32) {
    %c0_i32 = arith.constant 0 : i32
    %c0_i32_0 = arith.constant 0 : i32
    return %arg0, %c0_i32 : i32, i32
  }
}

</mosaic_0001>

<bundles_post_ra>
// kernel: tpu_custom_call.1
= control target key start
LH: loop header
LB: loop body
LE: loop exit
PB: predicated region body
PF: predicated region fallthrough
CT: control target
= control target key end

     0   :  { %s1713_s0 = inlined_call_operand.hbm [shape: f32[256,128], index: 0, kind: input, shape index: {}]   ;;  %s1714_s1 = inlined_call_operand.hbm [shape: bf16[128,256], index: 1, kind: input, shape index: {}]   ;;  %s1715_s2 = inlined_call_operand.hbm [shape: bf16[256,128], index: 2, kind: input, shape index: {}]   ;;  %s1716_s3 = inlined_call_operand.hbm [shape: bf16[256,128], index: 3, kind: output, shape index: {}]  }
   0x1   :  { %1730 = sst [smem:[#allocation21_spill]] %s1713_s0 }
   0x2   :  { %1731 = sst [smem:[#allocation22_spill]] %s1714_s1 }
   0x3   :  { %1732 = sst [smem:[#allocation23_spill]] %s1716_s3 }
   0x4   :  { %8 = vsyncpa [#allocation4], 0 }
   0x5   :  { %10 = vsyncpa [#allocation4 + $0x1], 0 }
   0x6   :  { %11 = vsyncpa [#allocation7], 0 }
   0x7   :  { %13 = vsyncpa [#allocation7 + $0x1], 0 }
   0x8   :  { %14 = vsyncpa [#allocation5], 0 }
   0x9   :  { %16 = vsyncpa [#allocation5 + $0x1], 0  ;;  %s1382_s12 = smov 0   ;;  %s1384_s13 = smov 0  }
   0xa   :  { %s1386_s14 = smov 0   ;;  %s1388_s15 = smov 0  }
   0xb   :  { %s1390_s16 = smov 0   ;;  %s1392_s17 = smov 0  }
   0xc   :  { %s1394_s18 = smov 0   ;;  %s1396_s19 = smov 0  }
   0xd   :  { %s1398_s20 = smov 0   ;;  %s1400_s21 = smov 0  }
   0xe   :  { %s1402_s22 = smov 0  }
   0xf LB: > { %1733 = sst [smem:[#allocation13_spill]] %s1315_s14  ;;  %s31_s23 = sadd.s32 1, %s1339_s20  ;;  %s1347_s22 = sphi %s1402_s22, %s22_s22   ;;  %s1343_s21 = sphi %s1400_s21, %s1767_s21   ;;  %s1339_s20 = sphi %s1398_s20, %s1773_s20   ;;  %s1335_s19 = sphi %s1396_s19, %s1765_s19   ;;  %s1331_s18 = sphi %s1394_s18, %s1772_s18   ;;  %s1327_s17 = sphi %s1392_s17, %s1764_s17   ;;  %s1323_s16 = sphi %s1390_s16, %s1771_s16   ;;  %s1319_s15 = sphi %s1388_s15, %s1770_s15   ;;  %s1315_s14 = sphi %s1386_s14, %s1762_s14   ;;  %s1311_s13 = sphi %s1384_s13, %s1769_s13   ;;  %s1307_s12 = sphi %s1382_s12, %s1768_s12  }
  0x10   : > { %1734 = sst [smem:[#allocation14_spill]] %s1327_s17  ;;  %p49_p0 = scmp.eq.s32.totalorder %s1347_s22, 0 }
  0x11   : > { %1735 = sst [smem:[#allocation15_spill]] %s1343_s21  ;;  %p1439_p1 = scmp.ge.s32.totalorder %s31_s23, 2 }
  0x12   : > { %s67_s25 = sadd.s32 1, %s1315_s14  ;;  %p74_p2 = scmp.ne.s32.totalorder %s1315_s14, %s1311_s13 }
  0x13   : > { %p80_p3 = scmp.ne.s32.totalorder %s1311_s13, %s1307_s12  ;;  %s1775_s23 = smov (%p1439_p1, %s31_s23), 0 }
  0x14   : > { %1737 = sst [smem:[#allocation16_spill]] %s1775_s23  ;;  %p1454_p4 = por %p74_p2, %p49_p0 }
  0x15   : > { %s64_s27 = ssub.s32 %s1339_s20, %s1775_s23  ;;  %p1720_p5 = scmp.lt.s32.totalorder %s1347_s22, 8 }
  0x16   : > { %p65_p6 = scmp.eq.s32.totalorder %s64_s27, 0  ;;  %s177_s28 = sand.u32 1, %s1347_s22  }
  0x17   : > { %s179_s29 = sand.u32 1, %s1315_s14   ;;  %s840_s5 = sshll.u32 %s1339_s20, 6 }
  0x18   : > { %s1464_s30 = scalar_select %p65_p6, %s1315_s14, %s67_s25  }
  0x19   : > { %s1466_s4 = sshll.u32 %s179_s29, 6  ;;  %s1740_s1 = sld [smem:[#allocation22_spill]] }
  0x1a   : > { %1739 = sst [smem:[#allocation17_spill]] %s1464_s30  ;;  %s181_s9 = scalar_lea.vmem [#allocation6], %s1466_s4 }
  0x1b   : > { %s187_s10 = sshll.u32 %s181_s9, 4  ;;  %p1477_p7 = pnand %p1720_p5, %p1454_p4  ;;  %s188_s10 = int_to_ptr.vmem [resolvable:$true] %s187_s10 }
  0x1c   : > { %p844_p8 = scmp.ge.s32.totalorder %s1347_s22, 1  ;;  %s1482_s25 = scalar_lea.sflag [#allocation7], %s177_s28 }
  0x1d   : > { %p1719_p9 = pneg %p1477_p7  ;;  %s1152_s27 = scalar_lea.vmem %s188_s10, 1024 }
  0x1e   : > { %p1153_p10 = scmp.ne.s32.totalorder %s188_s10, %s1152_s27  ;;  %s1349_s29 = smov [#allocation6]  }
  0x1f   : > { %s186_s8 = scalar_lea.hbm %s1740_s1, %s840_s5  ;;  %s1157_s26 = sshll.u32 %s1349_s29, 4  ;;  %s1158_s26 = int_to_ptr.vmem [resolvable:$false] %s1157_s26 }
  0x20   : > { %p1155_p11 = pnand %p1153_p10, %p1719_p9  ;;  %s1159_s5 = scalar_lea.vmem %s1158_s26, 2048 }
  0x21   : > { %p1160_p13 = scmp.lt.s32.totalorder %s188_s10, %s1158_s26  ;;  %p1161_p2 = scmp.lt.s32.totalorder %s1159_s5, %s1152_s27 }
  0x22   : > { %p1156_p12 = pneg %p1155_p11 }
  0x23   : > { %p1162_p4 = por %p1161_p2, %p1160_p13 }
  0x25   : > { %p1163_p6 = pnand %p1162_p4, %p1156_p12 }
  0x27   : > { %1166 = shalt.err (!%p1163_p6)
}
  0x28   : > { %s1721_s6 = smov 128   ;;  %s1717_s28 = smov 64  }
  0x29   : > { %s1718_s7 = smov 4   ;;  %p216_p10 = scmp.lt.s32.totalorder %s1347_s22, 9 }
  0x2a   : > { %1016 = dma.hbm_to_vmem [thread:$0]  (!%p1477_p7), %s186_s8, 1024, %s188_s10, %s1482_s25, %s1721_s6, %s1717_s28, %s1718_s7  }
  0x2b   : > { %p1498_p11 = pnand %p844_p8, %p216_p10  ;;  %s1503_s27 = sadd.s32 4294967295, %s1347_s22  }
  0x2c   : > { %s833_s29 = sadd.s32 4294967294, %s1347_s22   ;;  %s34_s26 = sadd.s32 1, %s1343_s21 }
  0x2d   : > { %s41_s5 = sadd.s32 1, %s1327_s17  ;;  %s1777_s26 = smov (!%p1439_p1, %s34_s26), %s1343_s21 }
  0x2e   : > { %p48_p12 = scmp.ne.s32.totalorder %s1327_s17, %s1323_s16  ;;  %p54_p13 = scmp.ne.s32.totalorder %s1323_s16, %s1319_s15 }
  0x2f   : > { %p36_p8 = scmp.ge.s32.totalorder %s1777_s26, 4  ;;  %p55_p2 = scmp.eq.s32.totalorder %s1503_s27, 0 }
  0x30   : > { %p1518_p4 = por %p49_p0, %p48_p12  ;;  %p130_p6 = scmp.eq.s32.totalorder %s1503_s27, 7 }
  0x31   : > { %s1779_s26 = smov (%p36_p8, %s1777_s26), 0  ;;  %p1528_p1 = por %p55_p2, %p54_p13 }
  0x32   : > { %1744 = sst [smem:[#allocation18_spill]] %s1779_s26  ;;  %p1535_p10 = por %p80_p3, %p55_p2 }
  0x33   : > { %s38_s28 = ssub.s32 %s1343_s21, %s1779_s26  ;;  %p1541_p0 = por %p130_p6, %p48_p12 }
  0x34   : > { %p39_p9 = scmp.eq.s32.totalorder %s38_s28, 0  ;;  %p136_p5 = scmp.eq.s32.totalorder %s833_s29, 7 }
  0x35   : > { %s1747_s7 = scalar_select %p1541_p0, 1, 0 }
  0x36   : > { %s156_s6 = sand.u32 1, %s1327_s17   ;;  %s904_s1 = sshll.u32 %s1343_s21, 10 }
  0x37   : > { %1748 = sst [smem:[#allocation19_spill]] %s1747_s7  ;;  %p1553_p8 = por %p136_p5, %p54_p13 }
  0x38   : > { %s1548_s23 = scalar_select %p39_p9, %s1327_s17, %s41_s5  }
  0x39   : > { %s1750_s30 = scalar_select %p1553_p8, 1, 0 }
  0x3a   : > { %1749 = sst [smem:[#allocation20_spill]] %s1548_s23  ;;  %s836_s12 = sshll.u32 %s156_s6, 6 }
  0x3b   : > { %s1751_s0 = sld [smem:[#allocation21_spill]]  ;;  %p1752_p3 = scmp.lt.s32.totalorder %s1347_s22, 8 }
  0x3c   : > { %s160_s28 = scalar_lea.vmem [#allocation3], %s836_s12  ;;  %s157_s5 = scalar_lea.sflag [#allocation4], %s156_s6 }
  0x3d   : > { %p1564_p12 = pnand %p1752_p3, %p1518_p4  ;;  %s167_s29 = sshll.u32 %s160_s28, 4  ;;  %s168_s29 = int_to_ptr.vmem [resolvable:$true] %s167_s29 }
  0x3e   : > { %s1180_s21 = scalar_lea.vmem %s168_s29, 1024  ;;  %s1353_s23 = smov [#allocation3]  }
  0x3f   : > { %p1169_p5 = pneg %p1564_p12  ;;  %p1181_p9 = scmp.ne.s32.totalorder %s168_s29, %s1180_s21 }
  0x40   : > { %s1185_s3 = sshll.u32 %s1353_s23, 4  ;;  %s1186_s3 = int_to_ptr.vmem [resolvable:$false] %s1185_s3 }
  0x41   : > { %s166_s26 = scalar_lea.hbm %s1751_s0, %s904_s1  ;;  %p1183_p13 = pnand %p1181_p9, %p1169_p5 }
  0x42   : > { %s1187_s1 = scalar_lea.vmem %s1186_s3, 2048  ;;  %p1188_p6 = scmp.lt.s32.totalorder %s168_s29, %s1186_s3 }
  0x43   : > { %p1184_p2 = pneg %p1183_p13  ;;  %p1189_p4 = scmp.lt.s32.totalorder %s1187_s1, %s1180_s21 }
  0x45   : > { %p1190_p3 = por %p1189_p4, %p1188_p6 }
  0x47   : > { %p1191_p8 = pnand %p1190_p3, %p1184_p2 }
  0x49   : > { %1194 = shalt.err (!%p1191_p8)
}
  0x4a   : > { %s1354_s14 = smov 8   ;;  %s1754_s8 = smov 128  }
  0x4b   : > { %1013 = dma.hbm_to_vmem [thread:$0]  (!%p1564_p12), %s166_s26, 1024, %s168_s29, %s157_s5, %s1754_s8, %s1754_s8, %s1354_s14  }
  0x4c   : > { %s905_s6 = sshll.u32 %s1339_s20, 10  ;;  %s201_s0 = scalar_lea.vmem [#allocation8], %s1466_s4 }
  0x4d   : > { %s207_s23 = scalar_lea.hbm %s1715_s2, %s905_s6  ;;  %s208_s3 = sshll.u32 %s201_s0, 4  ;;  %s209_s3 = int_to_ptr.vmem [resolvable:$true] %s208_s3 }
  0x4e   : > { %s1208_s21 = scalar_lea.vmem %s209_s3, 1024  ;;  %p1755_p8 = pneg %p1477_p7 }
  0x4f   : > { %p1209_p5 = scmp.ne.s32.totalorder %s209_s3, %s1208_s21  ;;  %s1355_s7 = smov [#allocation8]  }
  0x50   : > { %s1213_s1 = sshll.u32 %s1355_s7, 4  ;;  %s1214_s1 = int_to_ptr.vmem [resolvable:$false] %s1213_s1 }
  0x51   : > { %p1211_p9 = pnand %p1209_p5, %p1755_p8  ;;  %s1215_s17 = scalar_lea.vmem %s1214_s1, 2048 }
  0x52   : > { %p1216_p2 = scmp.lt.s32.totalorder %s209_s3, %s1214_s1  ;;  %p1217_p12 = scmp.lt.s32.totalorder %s1215_s17, %s1208_s21 }
  0x53   : > { %p1212_p13 = pneg %p1211_p9 }
  0x54   : > { %p1218_p6 = por %p1217_p12, %p1216_p2 }
  0x56   : > { %p1219_p4 = pnand %p1218_p6, %p1212_p13 }
  0x58   : > { %1222 = shalt.err (!%p1219_p4)
}
  0x59   : > { %s1756_s4 = smov 4   ;;  %s1757_s0 = smov 64  }
  0x5a   : > { %1019 = dma.hbm_to_vmem [thread:$0]  (!%p1477_p7), %s207_s23, 1024, %s209_s3, %s1482_s25, %s1757_s0, %s1757_s0, %s1756_s4  }
  0x5b   : > { %220 = sbr.rel (%p1498_p11) target bundleno = 595 (0x253), region = 32  ;;  %s1591_s26 = sand.u32 (!%p1498_p11), 1, %s1323_s16  }
  0x5c   : > { %s845_s17 = sshll.u32 (!%p1498_p11), %s1591_s26, 6  ;;  %s223_s29 = scalar_lea.sflag (!%p1498_p11), [#allocation4], %s1591_s26 }
  0x5d   : > { %s1595_s5 = scalar_lea.vmem (!%p1498_p11), [#allocation3], %s845_s17 }
  0x60   : > { %1294 = dma.done.wait (%p1528_p1), %s223_s29, 1024  }
  0x61   : > { %1296 = vsyncadd (%p1528_p1), %s223_s29, 4294966272  ;;  %s231_s11 = sand.u32 1, %s1503_s27   ;;  %s233_s25 = sand.u32 1, %s1311_s13  }
  0x62   : > { %s846_s9 = sshll.u32 %s233_s25, 6  ;;  %s232_s14 = scalar_lea.sflag [#allocation7], %s231_s11 }
  0x63   : > { %s1603_s8 = scalar_lea.vmem [#allocation6], %s846_s9 }
  0x64   : > { %1298 = dma.done.wait (%p1535_p10), %s232_s14, 2048  }
  0x65   : > { %1300 = vsyncadd (%p1535_p10), %s232_s14, 4294965248  ;;  %s848_s6 = sshll.u32 %s1591_s26, 5  ;;  %s1610_s12 = scalar_lea.vmem [#allocation8], %s846_s9 }
  0x66   : > { %s1612_s24 = scalar_lea.vmem [#allocation9], %s848_s6  ;;  %p849_p7 = scmp.ne.s32.totalorder %s1331_s18, 0 }
  0x68   : > { %284 = sbr.rel (%p849_p7) target bundleno = 114 (0x72), region = 48 }
  0x6d   : > { %v1356_v0 = vmov 0.0  }
  0x6e   : > { %285 = vst [vmem:[#allocation2 + $0x30] sm:$0xff] %v1356_v0  ;;  %286 = vst [vmem:[#allocation2] sm:$0xff] %v1356_v0 }
  0x6f   : > { %287 = vst [vmem:[#allocation2 + $0x18] sm:$0xff] %v1356_v0  ;;  %288 = vst [vmem:[#allocation2 + $0x10] sm:$0xff] %v1356_v0 }
  0x70   : > { %289 = vst [vmem:[#allocation2 + $0x8] sm:$0xff] %v1356_v0  ;;  %290 = vst [vmem:[#allocation2 + $0x20] sm:$0xff] %v1356_v0 }
  0x71   : > { %291 = vst [vmem:[#allocation2 + $0x28] sm:$0xff] %v1356_v0  ;;  %292 = vst [vmem:[#allocation2 + $0x38] sm:$0xff] %v1356_v0 }
  0x72 PF: > { %v1123_v1 = vld [vmem:[%s1603_s8 + $0x38] sm:$0xff]   ;;  %v1124_v2 = vld [vmem:[%s1603_s8 + $0x30] sm:$0xff]   ;;  %v1125_v3 = vld [vmem:[%s1603_s8 + $0x28] sm:$0xff]   ;;  %v1357_v34 = vmov 1.0|1.0   ;;  %p882_p11 = scmp.ne.s32.totalorder %s1331_s18, 1 }
  0x73   : > { %954 = vmatprep.subr.bf16.mxu0 %v1123_v1  ;;  %v1126_v4 = vld [vmem:[%s1603_s8 + $0x20] sm:$0xff]   ;;  %v294_v6 = vld [vmem:[%s1595_s5 + $0x8] sm:$0xff]  ;;  %v1127_v8 = vld [vmem:[%s1603_s8 + $0x18] sm:$0xff]  }
  0x74   : > { %955 = vmatpush3.bf16.msra.mxu0 %v1123_v1  ;;  %v293_v5 = vld [vmem:[%s1595_s5] sm:$0xff]  ;;  %v1131_v9 = vld [vmem:[%s1610_s12 + $0x38] sm:$0xff]   ;;  %v1132_v10 = vld [vmem:[%s1610_s12 + $0x30] sm:$0xff]  }
  0x75   : > { %956 = vmatprep.subr.bf16.mxu0 %v1124_v2  ;;  %v301_v7 = vpack.c.bf16 %v294_v6, %v293_v5  ;;  %978 = vmatprep.subr.bf16.mxu1 %v1131_v9  ;;  %v1133_v11 = vld [vmem:[%s1610_s12 + $0x28] sm:$0xff]   ;;  %v1128_v12 = vld [vmem:[%s1603_s8 + $0x10] sm:$0xff]   ;;  %v1134_v13 = vld [vmem:[%s1610_s12 + $0x20] sm:$0xff]  }
  0x76   : > { %979 = vmatpush3.bf16.msra.mxu1 %v1131_v9  ;;  %v1129_v14 = vld [vmem:[%s1603_s8 + $0x8] sm:$0xff]   ;;  %v1135_v15 = vld [vmem:[%s1610_s12 + $0x18] sm:$0xff]   ;;  %v1130_v16 = vld [vmem:[%s1603_s8] sm:$0xff]  }
  0x77   : > { %970 = vmatprep.mubr.bf16.mxu0 %v301_v7  ;;  %980 = vmatprep.subr.bf16.mxu1 %v1132_v10  ;;  %v295_v17 = vld [vmem:[%s1595_s5 + $0x10] sm:$0xff]  ;;  %v296_v18 = vld [vmem:[%s1595_s5 + $0x18] sm:$0xff]  ;;  %v297_v20 = vld [vmem:[%s1595_s5 + $0x20] sm:$0xff] }
  0x78   : > { %957 = vmatpush3.bf16.msra.mxu0 %v1124_v2  ;;  %v1136_v19 = vld [vmem:[%s1610_s12 + $0x10] sm:$0xff]   ;;  %v298_v21 = vld [vmem:[%s1595_s5 + $0x28] sm:$0xff]  ;;  %v302_v22 = vpack.c.bf16 %v296_v18, %v295_v17  ;;  %v300_v25 = vld [vmem:[%s1595_s5 + $0x38] sm:$0xff] }
  0x79   : > { %958 = vmatprep.subr.bf16.mxu0 %v1125_v3  ;;  %v303_v23 = vpack.c.bf16 %v298_v21, %v297_v20  ;;  %v299_v24 = vld [vmem:[%s1595_s5 + $0x30] sm:$0xff]  ;;  %v1137_v27 = vld [vmem:[%s1610_s12 + $0x8] sm:$0xff]   ;;  %v1138_v28 = vld [vmem:[%s1610_s12] sm:$0xff]  }
  0x7a   : > { %981 = vmatpush3.bf16.msra.mxu1 %v1132_v10  ;;  %v304_v26 = vpack.c.bf16 %v300_v25, %v299_v24  ;;  %v464_v38 = vld [vmem:[#allocation2 + $0x18] sm:$0xff]  ;;  %v462_v40 = vld [vmem:[#allocation2 + $0x30] sm:$0xff]  ;;  %v463_v46 = vld [vmem:[#allocation2] sm:$0xff] }
  0x7b   : > { %982 = vmatprep.subr.bf16.mxu1 %v1133_v11  ;;  %v465_v43 = vld [vmem:[#allocation2 + $0x10] sm:$0xff]  ;;  %v468_v49 = vld [vmem:[#allocation2 + $0x28] sm:$0xff]  ;;  %v469_v55 = vld [vmem:[#allocation2 + $0x38] sm:$0xff] }
  0x7c   : > { %959 = vmatpush3.bf16.msra.mxu0 %v1125_v3  ;;  %v466_v52 = vld [vmem:[#allocation2 + $0x8] sm:$0xff]  ;;  %v467_v58 = vld [vmem:[#allocation2 + $0x20] sm:$0xff] }
  0x7d   : > { %960 = vmatprep.subr.bf16.mxu0 %v1126_v4 }
  0x7e   : > { %983 = vmatpush3.bf16.msra.mxu1 %v1133_v11 }
  0x7f   : > { %984 = vmatprep.subr.bf16.mxu1 %v1134_v13 }
  0x80   : > { %961 = vmatpush3.bf16.msra.mxu0 %v1126_v4 }
  0x81   : > { %962 = vmatprep.subr.bf16.mxu0 %v1127_v8 }
  0x82   : > { %985 = vmatpush3.bf16.msra.mxu1 %v1134_v13 }
  0x83   : > { %986 = vmatprep.subr.bf16.mxu1 %v1135_v15 }
  0x84   : > { %963 = vmatpush3.bf16.msra.mxu0 %v1127_v8 }
  0x85   : > { %964 = vmatprep.subr.bf16.mxu0 %v1128_v12 }
  0x86   : > { %987 = vmatpush3.bf16.msra.mxu1 %v1135_v15 }
  0x87   : > { %988 = vmatprep.subr.bf16.mxu1 %v1136_v19 }
  0x88   : > { %965 = vmatpush3.bf16.msra.mxu0 %v1128_v12 }
  0x89   : > { %966 = vmatprep.subr.bf16.mxu0 %v1129_v14 }
  0x8a   : > { %989 = vmatpush3.bf16.msra.mxu1 %v1136_v19 }
  0x8b   : > { %990 = vmatprep.subr.bf16.mxu1 %v1137_v27 }
  0x8c   : > { %967 = vmatpush3.bf16.msra.mxu0 %v1129_v14 }
  0x8d   : > { %968 = vmatprep.subr.bf16.mxu0 %v1130_v16 }
  0x8e   : > { %991 = vmatpush3.bf16.msra.mxu1 %v1137_v27 }
  0x8f   : > { %992 = vmatprep.subr.bf16.mxu1 %v1138_v28 }
  0x90   : > { %969 = vmatpush3.bf16.msra.mxu0 %v1130_v16 }
  0x92   : > { %993 = vmatpush3.bf16.msra.mxu1 %v1138_v28 }
  0x93   : > { %971 = vmatmul.mubr.bf16.vlgmr.msra.gmra.mxu0 %v302_v22 }
  0x94   : > { %974 = vmatprep.mubr.bf16.mxu0 %v303_v23 }
  0x9b   : > { %975 = vmatmul.mubr.bf16.gmra.mxu0 %v304_v26 }
 0x153   : > { %v972_v29 = vpop.f32.mrf.mxu0 }
 0x154   : > { %vm436_vm3 = vcmp.ge.f32.partialorder %v972_v29, 1.0 }
 0x155   : > { %v403_v30 = vpop.f32.mrf.mxu0 }
 0x156   : > { %vm434_vm1 = vcmp.ge.f32.partialorder %v403_v30, 1.0 }
 0x157   : > { %v973_v31 = vpop.f32.mrf.mxu0 }
 0x158   : > { %vm437_vm0 = vcmp.ge.f32.partialorder %v973_v31, 1.0 }
 0x159   : > { %v406_v32 = vpop.f32.mrf.mxu0  ;;  %vm876_vm5 = vmpackc.low %vm437_vm0, %vm436_vm3 }
 0x15a   : > { %vm435_vm2 = vcmp.ge.f32.partialorder %v406_v32, 1.0 }
 0x15b   : > { %v976_v33 = vpop.f32.mrf.mxu0  ;;  %vm874_vm4 = vmpackc.low %vm435_vm2, %vm434_vm1 }
 0x15c   : > { %994 = vmatprep.mubr.msk.bf16.mxu1 %vm874_vm4, %v1357_v34  ;;  %vm440_vm9 = vcmp.ge.f32.partialorder %v976_v33, 1.0 }
 0x15d   : > { %v419_v35 = vpop.f32.mrf.mxu0  ;;  %995 = vmatmul.mubr.msk.bf16.vlgmr.msra.gmra.mxu1 %vm876_vm5, %v1357_v34 }
 0x15e   : > { %vm438_vm7 = vcmp.ge.f32.partialorder %v419_v35, 1.0 }
 0x15f   : > { %v977_v36 = vpop.f32.mrf.mxu0 }
 0x160   : > { %vm441_vm6 = vcmp.ge.f32.partialorder %v977_v36, 1.0 }
 0x161   : > { %v422_v37 = vpop.f32.mrf.mxu0  ;;  %vm880_vm11 = vmpackc.low %vm441_vm6, %vm440_vm9 }
 0x162   : > { %vm439_vm8 = vcmp.ge.f32.partialorder %v422_v37, 1.0 }
 0x163   : > { %vm878_vm10 = vmpackc.low %vm439_vm8, %vm438_vm7 }
 0x164   : > { %998 = vmatprep.mubr.msk.bf16.mxu1 %vm878_vm10, %v1357_v34 }
 0x165   : > { %999 = vmatmul.mubr.msk.bf16.gmra.mxu1 %vm880_vm11, %v1357_v34 }
 0x21d   : > { %v996_v39 = vpop.f32.mrf.mxu1 }
 0x21e   : > { %v601_v41 = vadd.f32 %v996_v39, %v464_v38 }
 0x21f   : > { %v568_v42 = vpop.f32.mrf.mxu1 }
 0x220   : > { %609 = vst [vmem:[#allocation2 + $0x18] sm:$0xff] %v601_v41  ;;  %v599_v44 = vadd.f32 %v568_v42, %v462_v40 }
 0x221   : > { %v997_v45 = vpop.f32.mrf.mxu1 }
 0x222   : > { %607 = vst [vmem:[#allocation2 + $0x30] sm:$0xff] %v599_v44  ;;  %v602_v47 = vadd.f32 %v997_v45, %v465_v43 }
 0x223   : > { %v571_v48 = vpop.f32.mrf.mxu1 }
 0x224   : > { %610 = vst [vmem:[#allocation2 + $0x10] sm:$0xff] %v602_v47  ;;  %v600_v50 = vadd.f32 %v571_v48, %v463_v46 }
 0x225   : > { %v1000_v51 = vpop.f32.mrf.mxu1 }
 0x226   : > { %608 = vst [vmem:[#allocation2] sm:$0xff] %v600_v50  ;;  %v605_v53 = vadd.f32 %v1000_v51, %v468_v49 }
 0x227   : > { %v584_v54 = vpop.f32.mrf.mxu1 }
 0x228   : > { %613 = vst [vmem:[#allocation2 + $0x28] sm:$0xff] %v605_v53  ;;  %v603_v56 = vadd.f32 %v584_v54, %v466_v52 }
 0x229   : > { %v1001_v57 = vpop.f32.mrf.mxu1 }
 0x22a   : > { %611 = vst [vmem:[#allocation2 + $0x8] sm:$0xff] %v603_v56  ;;  %v606_v59 = vadd.f32 %v1001_v57, %v469_v55  ;;  %618 = sbr.rel (%p882_p11) target bundleno = 571 (0x23b), region = 52 }
 0x22b   : > { %v587_v60 = vpop.f32.mrf.mxu1 }
 0x22c   : > { %614 = vst [vmem:[#allocation2 + $0x38] sm:$0xff] %v606_v59  ;;  %v604_v61 = vadd.f32 %v587_v60, %v467_v58 }
 0x22e   : > { %612 = vst [vmem:[#allocation2 + $0x20] sm:$0xff] %v604_v61 }
 0x22f   : > { %v619_v62 = vld [vmem:[#allocation2 + $0x30] sm:$0xff]  ;;  %v620_v63 = vld [vmem:[#allocation2] sm:$0xff]  ;;  %v621_v0 = vld [vmem:[#allocation2 + $0x18] sm:$0xff]  ;;  %v1358_v4 = vmov 0.0  }
 0x230   : > { %vm627_vm12 = vcmp.ge.f32.partialorder %v619_v62, 1.0  ;;  %vm628_vm13 = vcmp.ge.f32.partialorder %v620_v63, 1.0  ;;  %v622_v1 = vld [vmem:[#allocation2 + $0x10] sm:$0xff]  ;;  %vm629_vm14 = vcmp.ge.f32.partialorder %v621_v0, 1.0  ;;  %v625_v8 = vld [vmem:[#allocation2 + $0x28] sm:$0xff] }
 0x231   : > { %v623_v2 = vld [vmem:[#allocation2 + $0x8] sm:$0xff]  ;;  %v883_v5 = vsel %vm627_vm12, 1.0, %v1358_v4  ;;  %v884_v6 = vsel %vm628_vm13, 1.0, %v1358_v4  ;;  %vm630_vm15 = vcmp.ge.f32.partialorder %v622_v1, 1.0  ;;  %v885_v7 = vsel %vm629_vm14, 1.0, %v1358_v4 }
 0x232   : > { %v916_v10 = vpack.c.bf16 %v884_v6, %v883_v5  ;;  %v886_v11 = vsel %vm630_vm15, 1.0, %v1358_v4  ;;  %vm631_vm0 = vcmp.ge.f32.partialorder %v623_v2, 1.0  ;;  %vm633_vm2 = vcmp.ge.f32.partialorder %v625_v8, 1.0 }
 0x233   : > { %v626_v9 = vld [vmem:[#allocation2 + $0x38] sm:$0xff]  ;;  %v919_v12 = vpack.c.bf16 %v886_v11, %v885_v7  ;;  %v887_v13 = vsel %vm631_vm0, 1.0, %v1358_v4  ;;  %v889_v16 = vsel %vm633_vm2, 1.0, %v1358_v4 }
 0x234   : > { %917 = vst [vmem:[%s1612_s24] sm:$0xff] %v916_v10   ;;  %vm634_vm3 = vcmp.ge.f32.partialorder %v626_v9, 1.0 }
 0x235   : > { %v624_v3 = vld [vmem:[#allocation2 + $0x20] sm:$0xff]  ;;  %927 = vst [vmem:[%s1612_s24 + $0x8] sm:$0xff] %v919_v12   ;;  %v890_v17 = vsel %vm634_vm3, 1.0, %v1358_v4 }
 0x236   : > { %vm632_vm1 = vcmp.ge.f32.partialorder %v624_v3, 1.0  ;;  %v925_v18 = vpack.c.bf16 %v890_v17, %v889_v16 }
 0x237   : > { %v888_v14 = vsel %vm632_vm1, 1.0, %v1358_v4 }
 0x238   : > { %v922_v15 = vpack.c.bf16 %v888_v14, %v887_v13  ;;  %929 = vst [vmem:[%s1612_s24 + $0x18] sm:$0xff] %v925_v18  }
 0x23a   : > { %928 = vst [vmem:[%s1612_s24 + $0x10] sm:$0xff] %v922_v15  }
 0x23b PF: > { %s914_s27 = sshll.u32 %s1335_s19, 9  ;;  %s1759_s23 = sld [smem:[#allocation23_spill]] }
 0x23c   : > { %s705_s21 = sshll.u32 %s1612_s24, 4  ;;  %s692_s7 = scalar_lea.sflag [#allocation5], %s1591_s26  ;;  %s1651_s21 = int_to_ptr.vmem [resolvable:$true] %s705_s21 }
 0x23d   : > { %s1223_s1 = scalar_lea.vmem %s1651_s21, 512  ;;  %s1359_s4 = smov [#allocation9]  }
 0x23e   : > { %p1224_p1 = scmp.ne.s32.totalorder %s1651_s21, %s1223_s1  ;;  %s1227_s0 = sshll.u32 %s1359_s4, 4  ;;  %s1228_s0 = int_to_ptr.vmem [resolvable:$false] %s1227_s0 }
 0x23f   : > { %s1229_s19 = scalar_lea.vmem %s1228_s0, 1024  ;;  %p1230_p5 = scmp.lt.s32.totalorder %s1651_s21, %s1228_s0 }
 0x240   : > { %p1225_p10 = pnand %p1224_p1, %p1541_p0  ;;  %p1231_p8 = scmp.lt.s32.totalorder %s1229_s19, %s1223_s1 }
 0x241   : > { %s1648_s3 = scalar_lea.hbm %s1759_s23, %s914_s27 }
 0x242   : > { %p1226_p3 = pneg %p1225_p10  ;;  %p1232_p9 = por %p1231_p8, %p1230_p5 }
 0x244   : > { %p1233_p13 = pnand %p1232_p9, %p1226_p3 }
 0x246   : > { %1236 = shalt.err (!%p1233_p13)
}
 0x247   : > { %s1237_s17 = scalar_lea.hbm %s1648_s3, 512  ;;  %s1241_s11 = scalar_lea.hbm %s1759_s23, 2048 }
 0x248   : > { %p1238_p2 = scmp.ne.s32.totalorder %s1648_s3, %s1237_s17  ;;  %p1242_p4 = scmp.lt.s32.totalorder %s1648_s3, %s1759_s23 }
 0x249   : > { %p1243_p7 = scmp.lt.s32.totalorder %s1241_s11, %s1237_s17 }
 0x24a   : > { %p1239_p12 = pnand %p1238_p2, %p1541_p0 }
 0x24b   : > { %p1244_p11 = por %p1243_p7, %p1242_p4 }
 0x24c   : > { %p1240_p6 = pneg %p1239_p12 }
 0x24e   : > { %p1245_p1 = pnand %p1244_p11, %p1240_p6 }
 0x250   : > { %1248 = shalt.err (!%p1245_p1)
}
 0x251   : > { %s1360_s14 = smov 64   ;;  %s1361_s8 = smov 4  }
 0x252   : > { %1008 = dma.vmem_to_hbm [thread:$0]  (%p1541_p0), %s1651_s21, 512, %s1648_s3, %s692_s7, %s1360_s14, %s1360_s14, %s1361_s8  }
 0x253 PF: > { %p1025_p10 = scmp.ge.s32.totalorder %s1347_s22, 2  ;;  %s720_s6 = sand.u32 1, %s1319_s15  }
 0x254   : > { %p1760_p3 = scmp.ne.s32.totalorder %s1750_s30, 0  ;;  %s721_s12 = scalar_lea.sflag [#allocation5], %s720_s6 }
 0x256   : > { %p1021_p5 = pnand %p1025_p10, %p1760_p3 }
 0x258   : > { %p1022_p8 = pneg %p1021_p5 }
 0x25a   : > { %1302 = dma.done.wait (%p1022_p8), %s721_s12, 512  }
 0x25b   : > { %1304 = vsyncadd (%p1022_p8), %s721_s12, 4294966784  ;;  %s22_s22 = sadd.s32 1, %s1347_s22   ;;  %s1761_s24 = sld [smem:[#allocation13_spill]] }
 0x25c   : > { %p19_p9 = scmp.ge.s32.totalorder %s22_s22, 10   ;;  %s1762_s14 = sld [smem:[#allocation17_spill]] }
 0x25d   : > { %s1763_s26 = sld [smem:[#allocation14_spill]]  ;;  %s1768_s12 = smov %s1311_s13 }
 0x25e   : > { %s1764_s17 = sld [smem:[#allocation20_spill]]  ;;  %s1770_s15 = smov %s1323_s16 }
 0x25f   : > { %s1765_s19 = sld [smem:[#allocation15_spill]]  ;;  %s1772_s18 = smov %s1339_s20 }
 0x260   : > { %s1766_s27 = sld [smem:[#allocation16_spill]] }
 0x261   : > { %s1767_s21 = sld [smem:[#allocation18_spill]]  ;;  %s1769_s13 = smov %s1761_s24 }
 0x262   :  { %21 = sbr.rel (!%p19_p9) target bundleno = 15 (0xf), region = 109 }
 0x263   : > { %s1771_s16 = smov %s1763_s26 }
 0x266   : > { %s1773_s20 = smov %s1766_s27 }
 0x267   :  { %726 = vsyncpa [#allocation4], 1 }
 0x268   :  { %728 = vsyncpa [#allocation4 + $0x1], 1 }
 0x269   :  { %729 = vsyncpa [#allocation7], 1 }
 0x26a   :  { %731 = vsyncpa [#allocation7 + $0x1], 1 }
 0x26b   :  { %732 = vsyncpa [#allocation5], 1 }
 0x26c   :  { %734 = vsyncpa [#allocation5 + $0x1], 1 }

</bundles_post_ra>
